<compile_context>
chip_gen: v7x
topology: tpu7x:2x2x1
jax: 0.10.0
libtpu: 0.0.40
codegen_flags: <defaults>
</compile_context>

<pallas_src>
import functools

import jax
import jax.numpy as jnp
from jax.experimental import pallas as pl
from jax.experimental.pallas import tpu as pltpu


# ---------------------------------------------------------------------------
# small helpers
# ---------------------------------------------------------------------------
def _round_up(x, m):
    return pl.cdiv(x, m) * m


def _m_tiling(m, tile_cap=256):
    """Pick (tile_m, Mp): tile_m multiple of 16 (bf16 sublane), Mp % tile_m == 0.

    tile_cap=256 keeps 2x(tile_m*Kp + tile_m*Np) bf16/f32 buffers + the full
    weight block well under v7x's ~32 MiB default scoped VMEM.
    """
    mp = _round_up(m, 16)
    if mp <= tile_cap:
        return mp, mp
    tile_m = tile_cap
    return tile_m, _round_up(mp, tile_m)


def _pad_weight_bf16(w):
    """(K, N) f32 -> (Kp, Np) bf16, zero padded to (128,128)-aligned tiles."""
    k, n = w.shape
    kp, np_ = _round_up(k, 128), _round_up(n, 128)
    return jnp.pad(w, ((0, kp - k), (0, np_ - n))).astype(jnp.bfloat16)


def _pad_bias_f32(b):
    """(N,) -> (1, Np) f32, zero padded so padded output lanes stay 0 after ReLU."""
    n = b.shape[0]
    np_ = _round_up(n, 128)
    return jnp.pad(b, (0, np_ - n)).reshape(1, np_).astype(jnp.float32)


# ---------------------------------------------------------------------------
# Pallas kernels
# ---------------------------------------------------------------------------
def _gemm_bias_relu_kernel(a_ref, w_ref, b_ref, o_ref):
    # A tile (tile_m, Kp) bf16, W (Kp, Np) bf16 -> f32 accumulate on the MXU,
    # bias + ReLU epilogue in f32 on the VPU (v5e has no bf16 VPU path).
    acc = jnp.dot(a_ref[...], w_ref[...], preferred_element_type=jnp.float32)
    o_ref[...] = jnp.maximum(acc + b_ref[...], 0.0)


def _fused_conv3_linear_kernel(a_ref, w3_ref, b3_ref, wl_ref, bl_ref, o_ref):
    # relu(A @ W3 + b3) @ WL + bl, relu — conv3 + flatten(1x1) + Linear fused.
    h = jnp.dot(a_ref[...], w3_ref[...], preferred_element_type=jnp.float32)
    h = jnp.maximum(h + b3_ref[...], 0.0)
    out = jnp.dot(h.astype(jnp.bfloat16), wl_ref[...],
                  preferred_element_type=jnp.float32)
    o_ref[...] = jnp.maximum(out + bl_ref[...], 0.0)


# ---------------------------------------------------------------------------
# wrappers
# ---------------------------------------------------------------------------
def gemm_bias_relu(a, w_pad, b_pad, *, out_dim, tile_cap=256):
    """relu(A @ W + b) with M tiled over the grid. W/b are pre-padded bf16/f32."""
    m, k = a.shape
    kp, np_ = w_pad.shape
    tile_m, mp = _m_tiling(m, tile_cap)

    a_p = jnp.pad(a.astype(jnp.bfloat16), ((0, mp - m), (0, kp - k)))

    out = pl.pallas_call(
        _gemm_bias_relu_kernel,
        out_shape=jax.ShapeDtypeStruct((mp, np_), jnp.float32),
        grid=(mp // tile_m,),
        in_specs=[
            pl.BlockSpec((tile_m, kp), lambda i: (i, 0)),
            pl.BlockSpec((kp, np_), lambda i: (0, 0)),
            pl.BlockSpec((1, np_), lambda i: (0, 0)),
        ],
        out_specs=pl.BlockSpec((tile_m, np_), lambda i: (i, 0)),
        compiler_params=pltpu.CompilerParams(
            dimension_semantics=("parallel",)),
    )(a_p, w_pad, b_pad)
    # TODO(synk): for much larger K (real 84x84 Atari inputs) split K across the
    # grid with an accumulator scratch + pl.when init/finalize.
    return out[:m, :out_dim]


def fused_conv3_linear(a, w3_pad, b3_pad, wl_pad, bl_pad, *, out_dim,
                       tile_cap=256):
    """relu(relu(A @ W3 + b3) @ WL + bl) in one Pallas call (1x1 spatial case)."""
    m, k = a.shape
    k3p, n3p = w3_pad.shape
    klp, nlp = wl_pad.shape
    assert n3p == klp, "wl K padding must match w3 N padding"
    tile_m, mp = _m_tiling(m, tile_cap)

    a_p = jnp.pad(a.astype(jnp.bfloat16), ((0, mp - m), (0, k3p - k)))

    out = pl.pallas_call(
        _fused_conv3_linear_kernel,
        out_shape=jax.ShapeDtypeStruct((mp, nlp), jnp.float32),
        grid=(mp // tile_m,),
        in_specs=[
            pl.BlockSpec((tile_m, k3p), lambda i: (i, 0)),
            pl.BlockSpec((k3p, n3p), lambda i: (0, 0)),
            pl.BlockSpec((1, n3p), lambda i: (0, 0)),
            pl.BlockSpec((klp, nlp), lambda i: (0, 0)),
            pl.BlockSpec((1, nlp), lambda i: (0, 0)),
        ],
        out_specs=pl.BlockSpec((tile_m, nlp), lambda i: (i, 0)),
        compiler_params=pltpu.CompilerParams(
            dimension_semantics=("parallel",)),
    )(a_p, w3_pad, b3_pad, wl_pad, bl_pad)
    return out[:m, :out_dim]


# ---------------------------------------------------------------------------
# im2col for NHWC activations (layout glue, plain JAX).
# K dimension ordered as (kh, kw, c): index = (i*KW + j)*C + c, matching the
# (KH, KW, IC, OC)-reshaped conv weights built in init_params.
# ---------------------------------------------------------------------------
def im2col_nhwc(x, kh, kw, stride):
    b, h, w, c = x.shape
    oh = (h - kh) // stride + 1
    ow = (w - kw) // stride + 1
    cols = []
    for i in range(kh):
        for j in range(kw):
            cols.append(
                x[:, i:i + stride * oh:stride, j:j + stride * ow:stride, :])
    p = jnp.stack(cols, axis=3)                  # (B, OH, OW, KH*KW, C)
    p = p.reshape(b * oh * ow, kh * kw * c)
    return p, oh, ow
    # TODO(synk): longer term, gather the patches inside the kernel (shifted
    # NHWC VMEM slices + accumulated matmuls) to avoid HBM patch duplication.


def calc_flatten_size(h, w, filt, stride):
    return (h - filt) // stride + 1, (w - filt) // stride + 1


# ---------------------------------------------------------------------------
# CNNBase forward:  x/255 -> conv(32,8,4)+ReLU -> conv(64,4,2)+ReLU
#                         -> conv(32,3,1)+ReLU -> flatten -> Linear+ReLU
# (x/255 is folded into the conv1 weights at init.)
# ---------------------------------------------------------------------------
def cnn_base_forward(x, params, *, hidden_size):
    b = x.shape[0]
    x = jnp.transpose(x, (0, 2, 3, 1))           # single NCHW -> NHWC transpose

    # conv1: 8x8 stride 4, ReLU (x/255 already folded into w1)
    a, oh, ow = im2col_nhwc(x, 8, 8, 4)
    y = gemm_bias_relu(a, params["w1"], params["b1"], out_dim=32)
    x = y.reshape(b, oh, ow, 32)

    # conv2: 4x4 stride 2, ReLU
    a, oh, ow = im2col_nhwc(x, 4, 4, 2)
    y = gemm_bias_relu(a, params["w2"], params["b2"], out_dim=64)
    x = y.reshape(b, oh, ow, 64)

    # conv3: 3x3 stride 1, ReLU, then Flatten + Linear + ReLU
    a, oh, ow = im2col_nhwc(x, 3, 3, 1)
    if oh * ow == 1:
        # spatial collapses to 1x1 -> flatten is identity -> fuse the last two
        # GEMMs into one kernel (one launch, no intermediate HBM round-trip).
        return fused_conv3_linear(a, params["w3"], params["b3"],
                                  params["wl"], params["bl"],
                                  out_dim=hidden_size)

    y = gemm_bias_relu(a, params["w3"], params["b3"], out_dim=32)
    flat = y.reshape(b, oh * ow * 32)            # NHWC flatten order (h, w, c)
    return gemm_bias_relu(flat, params["wl"], params["bl"], out_dim=hidden_size)


# ---------------------------------------------------------------------------
# parameter init (weights pre-reordered / pre-padded / bf16, biases f32)
# ---------------------------------------------------------------------------
def init_params(key, obs_shape, hidden_size):
    # TODO(synk): the reference uses orthogonal/xavier init with a relu gain;
    # deterministic Gaussian init here (biases zero, matching constant_(0)).
    c, h, w = obs_shape
    fh, fw = calc_flatten_size(h, w, 8, 4)
    fh, fw = calc_flatten_size(fh, fw, 4, 2)
    fh, fw = calc_flatten_size(fh, fw, 3, 1)

    k1, k2, k3, k4 = jax.random.split(key, 4)
    s = 0.05
    w1_t = jax.random.normal(k1, (32, c, 8, 8), jnp.float32) * s
    w2_t = jax.random.normal(k2, (64, 32, 4, 4), jnp.float32) * s
    w3_t = jax.random.normal(k3, (32, 64, 3, 3), jnp.float32) * s
    wl_t = jax.random.normal(k4, (hidden_size, 32 * fh * fw), jnp.float32) * s

    def conv_to_gemm(wt):            # (OC, IC, KH, KW) -> (KH*KW*IC, OC)
        oc = wt.shape[0]
        return jnp.transpose(wt, (2, 3, 1, 0)).reshape(-1, oc)

    w1 = conv_to_gemm(w1_t) * (1.0 / 255.0)   # fold x/255 into conv1 weights
    w2 = conv_to_gemm(w2_t)
    w3 = conv_to_gemm(w3_t)
    # NHWC flatten order is (h, w, c); a PyTorch checkpoint's (c, h, w) Linear
    # weight would need a one-time permute here.  (Trivial when fh*fw == 1.)
    wl = wl_t.T                                # (32*fh*fw, hidden)

    return {
        "w1": _pad_weight_bf16(w1), "b1": _pad_bias_f32(jnp.zeros((32,))),
        "w2": _pad_weight_bf16(w2), "b2": _pad_bias_f32(jnp.zeros((64,))),
        "w3": _pad_weight_bf16(w3), "b3": _pad_bias_f32(jnp.zeros((32,))),
        "wl": _pad_weight_bf16(wl), "bl": _pad_bias_f32(jnp.zeros((hidden_size,))),
    }


if __name__ == "__main__":
    key = jax.random.PRNGKey(0)
    kx, kp = jax.random.split(key)

    # obs_shape = (C, H, W); 36x36 is the smallest spatial size that survives
    # the 8/4 -> 4/2 -> 3/1 conv stack (final spatial 1x1).
    B, C, H, W = 2, 4, 36, 36
    hidden_size = 32

    # Simulated uint8-style observations in [0, 255)
    x = jax.random.uniform(kx, (B, C, H, W), jnp.float32, 0.0, 255.0)
    params = init_params(kp, (C, H, W), hidden_size)

    fwd = jax.jit(functools.partial(cnn_base_forward, hidden_size=hidden_size))
    out = fwd(x, params)
    jax.block_until_ready(out)

    assert out.shape == (B, hidden_size), out.shape
    assert bool(jnp.all(jnp.isfinite(out)))
    print("KERNEL_OK")
</pallas_src>

<mosaic_0001>
module attributes {stable_mosaic.version = 11 : i64} {
  func.func @_gemm_bias_relu_kernel(%arg0: i32, %arg1: memref<128x256xbf16, #tpu.memory_space<vmem>>, %arg2: memref<256x128xbf16, #tpu.memory_space<vmem>>, %arg3: memref<1x128xf32, #tpu.memory_space<vmem>>, %arg4: memref<128x128xf32, #tpu.memory_space<vmem>>) attributes {dimension_semantics = [#tpu.dimension_semantics<parallel>], iteration_bounds = array<i64: 1>, scalar_prefetch = 0 : i64, scratch_operands = 0 : i64, tpu.core_type = #tpu.core_type<tc>, window_params = [{transform_indices = @transform_0, window_bounds = array<i64: 128, 256>}, {pipeline_mode = #tpu.pipeline_mode<synchronous>, transform_indices = @transform_1, window_bounds = array<i64: 256, 128>}, {pipeline_mode = #tpu.pipeline_mode<synchronous>, transform_indices = @transform_2, window_bounds = array<i64: 1, 128>}, {transform_indices = @transform_3, window_bounds = array<i64: 128, 128>}]} {
    %c0 = arith.constant 0 : index
    %c0_0 = arith.constant 0 : index
    %0 = vector.load %arg1[%c0, %c0_0] : memref<128x256xbf16, #tpu.memory_space<vmem>>, vector<128x256xbf16>
    %c0_1 = arith.constant 0 : index
    %c0_2 = arith.constant 0 : index
    %1 = vector.load %arg2[%c0_1, %c0_2] : memref<256x128xbf16, #tpu.memory_space<vmem>>, vector<256x128xbf16>
    %cst = arith.constant dense<0.000000e+00> : vector<128x128xf32>
    %2 = tpu.matmul %0, %1, %cst {dimension_numbers = #tpu.dot_dimension_numbers<[1], [0], [0], [1], [0, 0, 1, 1], [], []>} : vector<128x256xbf16>, vector<256x128xbf16>, vector<128x128xf32> -> vector<128x128xf32>
    %c0_3 = arith.constant 0 : index
    %c0_4 = arith.constant 0 : index
    %3 = vector.load %arg3[%c0_3, %c0_4] : memref<1x128xf32, #tpu.memory_space<vmem>>, vector<1x128xf32>
    %4 = vector.broadcast %3 : vector<1x128xf32> to vector<128x128xf32>
    %5 = arith.addf %2, %4 : vector<128x128xf32>
    %cst_5 = arith.constant 0.000000e+00 : f32
    %6 = vector.broadcast %cst_5 : f32 to vector<128x128xf32>
    %7 = arith.maximumf %5, %6 : vector<128x128xf32>
    %c0_6 = arith.constant 0 : index
    %c0_7 = arith.constant 0 : index
    %8 = vector.load %arg4[%c0_6, %c0_7] : memref<128x128xf32, #tpu.memory_space<vmem>>, vector<128x128xf32>
    tpu.vector_store %arg4[%c0_6, %c0_7], %7 {strides = array<i32>} : memref<128x128xf32, #tpu.memory_space<vmem>>, vector<128x128xf32>,
    return
  }
  func.func @transform_0(%arg0: i32) -> (i32, i32) {
    %c0_i32 = arith.constant 0 : i32
    %c0_i32_0 = arith.constant 0 : i32
    return %arg0, %c0_i32 : i32, i32
  }
  func.func @transform_1(%arg0: i32) -> (i32, i32) {
    %c0_i32 = arith.constant 0 : i32
    %c0_i32_0 = arith.constant 0 : i32
    %c0_i32_1 = arith.constant 0 : i32
    return %c0_i32, %c0_i32_0 : i32, i32
  }
  func.func @transform_2(%arg0: i32) -> (i32, i32) {
    %c0_i32 = arith.constant 0 : i32
    %c0_i32_0 = arith.constant 0 : i32
    %c0_i32_1 = arith.constant 0 : i32
    return %c0_i32, %c0_i32_0 : i32, i32
  }
  func.func @transform_3(%arg0: i32) -> (i32, i32) {
    %c0_i32 = arith.constant 0 : i32
    %c0_i32_0 = arith.constant 0 : i32
    return %arg0, %c0_i32 : i32, i32
  }
}

module attributes {stable_mosaic.version = 11 : i64} {
  func.func @_gemm_bias_relu_kernel(%arg0: i32, %arg1: memref<32x512xbf16, #tpu.memory_space<vmem>>, %arg2: memref<512x128xbf16, #tpu.memory_space<vmem>>, %arg3: memref<1x128xf32, #tpu.memory_space<vmem>>, %arg4: memref<32x128xf32, #tpu.memory_space<vmem>>) attributes {dimension_semantics = [#tpu.dimension_semantics<parallel>], iteration_bounds = array<i64: 1>, scalar_prefetch = 0 : i64, scratch_operands = 0 : i64, tpu.core_type = #tpu.core_type<tc>, window_params = [{transform_indices = @transform_0, window_bounds = array<i64: 32, 512>}, {pipeline_mode = #tpu.pipeline_mode<synchronous>, transform_indices = @transform_1, window_bounds = array<i64: 512, 128>}, {pipeline_mode = #tpu.pipeline_mode<synchronous>, transform_indices = @transform_2, window_bounds = array<i64: 1, 128>}, {transform_indices = @transform_3, window_bounds = array<i64: 32, 128>}]} {
    %c0 = arith.constant 0 : index
    %c0_0 = arith.constant 0 : index
    %0 = vector.load %arg1[%c0, %c0_0] : memref<32x512xbf16, #tpu.memory_space<vmem>>, vector<32x512xbf16>
    %c0_1 = arith.constant 0 : index
    %c0_2 = arith.constant 0 : index
    %1 = vector.load %arg2[%c0_1, %c0_2] : memref<512x128xbf16, #tpu.memory_space<vmem>>, vector<512x128xbf16>
    %cst = arith.constant dense<0.000000e+00> : vector<32x128xf32>
    %2 = tpu.matmul %0, %1, %cst {dimension_numbers = #tpu.dot_dimension_numbers<[1], [0], [0], [1], [0, 0, 1, 1], [], []>} : vector<32x512xbf16>, vector<512x128xbf16>, vector<32x128xf32> -> vector<32x128xf32>
    %c0_3 = arith.constant 0 : index
    %c0_4 = arith.constant 0 : index
    %3 = vector.load %arg3[%c0_3, %c0_4] : memref<1x128xf32, #tpu.memory_space<vmem>>, vector<1x128xf32>
    %4 = vector.broadcast %3 : vector<1x128xf32> to vector<32x128xf32>
    %5 = arith.addf %2, %4 : vector<32x128xf32>
    %cst_5 = arith.constant 0.000000e+00 : f32
    %6 = vector.broadcast %cst_5 : f32 to vector<32x128xf32>
    %7 = arith.maximumf %5, %6 : vector<32x128xf32>
    %c0_6 = arith.constant 0 : index
    %c0_7 = arith.constant 0 : index
    %8 = vector.load %arg4[%c0_6, %c0_7] : memref<32x128xf32, #tpu.memory_space<vmem>>, vector<32x128xf32>
    tpu.vector_store %arg4[%c0_6, %c0_7], %7 {strides = array<i32>} : memref<32x128xf32, #tpu.memory_space<vmem>>, vector<32x128xf32>,
    return
  }
  func.func @transform_0(%arg0: i32) -> (i32, i32) {
    %c0_i32 = arith.constant 0 : i32
    %c0_i32_0 = arith.constant 0 : i32
    return %arg0, %c0_i32 : i32, i32
  }
  func.func @transform_1(%arg0: i32) -> (i32, i32) {
    %c0_i32 = arith.constant 0 : i32
    %c0_i32_0 = arith.constant 0 : i32
    %c0_i32_1 = arith.constant 0 : i32
    return %c0_i32, %c0_i32_0 : i32, i32
  }
  func.func @transform_2(%arg0: i32) -> (i32, i32) {
    %c0_i32 = arith.constant 0 : i32
    %c0_i32_0 = arith.constant 0 : i32
    %c0_i32_1 = arith.constant 0 : i32
    return %c0_i32, %c0_i32_0 : i32, i32
  }
  func.func @transform_3(%arg0: i32) -> (i32, i32) {
    %c0_i32 = arith.constant 0 : i32
    %c0_i32_0 = arith.constant 0 : i32
    return %arg0, %c0_i32 : i32, i32
  }
}

module attributes {stable_mosaic.version = 11 : i64} {
  func.func @_fused_conv3_linear_kernel(%arg0: i32, %arg1: memref<16x640xbf16, #tpu.memory_space<vmem>>, %arg2: memref<640x128xbf16, #tpu.memory_space<vmem>>, %arg3: memref<1x128xf32, #tpu.memory_space<vmem>>, %arg4: memref<128x128xbf16, #tpu.memory_space<vmem>>, %arg5: memref<1x128xf32, #tpu.memory_space<vmem>>, %arg6: memref<16x128xf32, #tpu.memory_space<vmem>>) attributes {dimension_semantics = [#tpu.dimension_semantics<parallel>], iteration_bounds = array<i64: 1>, scalar_prefetch = 0 : i64, scratch_operands = 0 : i64, tpu.core_type = #tpu.core_type<tc>, window_params = [{transform_indices = @transform_0, window_bounds = array<i64: 16, 640>}, {pipeline_mode = #tpu.pipeline_mode<synchronous>, transform_indices = @transform_1, window_bounds = array<i64: 640, 128>}, {pipeline_mode = #tpu.pipeline_mode<synchronous>, transform_indices = @transform_2, window_bounds = array<i64: 1, 128>}, {pipeline_mode = #tpu.pipeline_mode<synchronous>, transform_indices = @transform_3, window_bounds = array<i64: 128, 128>}, {pipeline_mode = #tpu.pipeline_mode<synchronous>, transform_indices = @transform_4, window_bounds = array<i64: 1, 128>}, {transform_indices = @transform_5, window_bounds = array<i64: 16, 128>}]} {
    %c0 = arith.constant 0 : index
    %c0_0 = arith.constant 0 : index
    %0 = vector.load %arg1[%c0, %c0_0] : memref<16x640xbf16, #tpu.memory_space<vmem>>, vector<16x640xbf16>
    %c0_1 = arith.constant 0 : index
    %c0_2 = arith.constant 0 : index
    %1 = vector.load %arg2[%c0_1, %c0_2] : memref<640x128xbf16, #tpu.memory_space<vmem>>, vector<640x128xbf16>
    %cst = arith.constant dense<0.000000e+00> : vector<16x128xf32>
    %2 = tpu.matmul %0, %1, %cst {dimension_numbers = #tpu.dot_dimension_numbers<[1], [0], [0], [1], [0, 0, 1, 1], [], []>} : vector<16x640xbf16>, vector<640x128xbf16>, vector<16x128xf32> -> vector<16x128xf32>
    %c0_3 = arith.constant 0 : index
    %c0_4 = arith.constant 0 : index
    %3 = vector.load %arg3[%c0_3, %c0_4] : memref<1x128xf32, #tpu.memory_space<vmem>>, vector<1x128xf32>
    %4 = vector.broadcast %3 : vector<1x128xf32> to vector<16x128xf32>
    %5 = arith.addf %2, %4 : vector<16x128xf32>
    %cst_5 = arith.constant 0.000000e+00 : f32
    %6 = vector.broadcast %cst_5 : f32 to vector<16x128xf32>
    %7 = arith.maximumf %5, %6 : vector<16x128xf32>
    %8 = arith.truncf %7 : vector<16x128xf32> to vector<16x128xbf16>
    %c0_6 = arith.constant 0 : index
    %c0_7 = arith.constant 0 : index
    %9 = vector.load %arg4[%c0_6, %c0_7] : memref<128x128xbf16, #tpu.memory_space<vmem>>, vector<128x128xbf16>
    %cst_8 = arith.constant dense<0.000000e+00> : vector<16x128xf32>
    %10 = tpu.matmul %8, %9, %cst_8 {dimension_numbers = #tpu.dot_dimension_numbers<[1], [0], [0], [1], [0, 0, 1, 1], [], []>} : vector<16x128xbf16>, vector<128x128xbf16>, vector<16x128xf32> -> vector<16x128xf32>
    %c0_9 = arith.constant 0 : index
    %c0_10 = arith.constant 0 : index
    %11 = vector.load %arg5[%c0_9, %c0_10] : memref<1x128xf32, #tpu.memory_space<vmem>>, vector<1x128xf32>
    %12 = vector.broadcast %11 : vector<1x128xf32> to vector<16x128xf32>
    %13 = arith.addf %10, %12 : vector<16x128xf32>
    %cst_11 = arith.constant 0.000000e+00 : f32
    %14 = vector.broadcast %cst_11 : f32 to vector<16x128xf32>
    %15 = arith.maximumf %13, %14 : vector<16x128xf32>
    %c0_12 = arith.constant 0 : index
    %c0_13 = arith.constant 0 : index
    %16 = vector.load %arg6[%c0_12, %c0_13] : memref<16x128xf32, #tpu.memory_space<vmem>>, vector<16x128xf32>
    tpu.vector_store %arg6[%c0_12, %c0_13], %15 {strides = array<i32>} : memref<16x128xf32, #tpu.memory_space<vmem>>, vector<16x128xf32>,
    return
  }
  func.func @transform_0(%arg0: i32) -> (i32, i32) {
    %c0_i32 = arith.constant 0 : i32
    %c0_i32_0 = arith.constant 0 : i32
    return %arg0, %c0_i32 : i32, i32
  }
  func.func @transform_1(%arg0: i32) -> (i32, i32) {
    %c0_i32 = arith.constant 0 : i32
    %c0_i32_0 = arith.constant 0 : i32
    %c0_i32_1 = arith.constant 0 : i32
    return %c0_i32, %c0_i32_0 : i32, i32
  }
  func.func @transform_2(%arg0: i32) -> (i32, i32) {
    %c0_i32 = arith.constant 0 : i32
    %c0_i32_0 = arith.constant 0 : i32
    %c0_i32_1 = arith.constant 0 : i32
    return %c0_i32, %c0_i32_0 : i32, i32
  }
  func.func @transform_3(%arg0: i32) -> (i32, i32) {
    %c0_i32 = arith.constant 0 : i32
    %c0_i32_0 = arith.constant 0 : i32
    %c0_i32_1 = arith.constant 0 : i32
    return %c0_i32, %c0_i32_0 : i32, i32
  }
  func.func @transform_4(%arg0: i32) -> (i32, i32) {
    %c0_i32 = arith.constant 0 : i32
    %c0_i32_0 = arith.constant 0 : i32
    %c0_i32_1 = arith.constant 0 : i32
    return %c0_i32, %c0_i32_0 : i32, i32
  }
  func.func @transform_5(%arg0: i32) -> (i32, i32) {
    %c0_i32 = arith.constant 0 : i32
    %c0_i32_0 = arith.constant 0 : i32
    return %arg0, %c0_i32 : i32, i32
  }
}

</mosaic_0001>

<bundles_post_ra>
// kernel: cnn_base_forward.3
= control target key start
LH: loop header
LB: loop body
LE: loop exit
PB: predicated region body
PF: predicated region fallthrough
CT: control target
= control target key end

     0   :  { %s717_s1 = inlined_call_operand.vmem [shape: bf16[256,128], index: 1, kind: input, shape index: {}]   ;;  %s718_s0 = inlined_call_operand.vmem [shape: bf16[128,256], index: 0, kind: input, shape index: {}]   ;;  %s719_s2 = inlined_call_operand.vmem [shape: f32[1,128], index: 2, kind: input, shape index: {}]   ;;  %s720_s3 = inlined_call_operand.vmem [shape: f32[128,128], index: 3, kind: output, shape index: {}]  }
   0x1   :  { %v492_v0 = vld [vmem:[%s717_s1 + $0x40] sm:$0xff]   ;;  %v494_v2 = vld [vmem:[%s717_s1 + $0x48] sm:$0xff]   ;;  %v496_v4 = vld [vmem:[%s717_s1 + $0x50] sm:$0xff]  }
   0x2   :  { %v493_v1 = vld [vmem:[%s717_s1] sm:$0xff]   ;;  %412 = vmatprep.subr.bf16.mxu0 %v492_v0  ;;  %476 = vmatprep.subr.bf16.mxu1 %v492_v0  ;;  %v495_v3 = vld [vmem:[%s717_s1 + $0x8] sm:$0xff]   ;;  %v497_v5 = vld [vmem:[%s717_s1 + $0x10] sm:$0xff]  }
   0x3   :  { %413 = vmatpush3.bf16.msra.mxu0 %v493_v1  ;;  %484 = vmatpush3.bf16.msra.mxu1 %v493_v1  ;;  %v498_v6 = vld [vmem:[%s717_s1 + $0x58] sm:$0xff]   ;;  %v500_v8 = vld [vmem:[%s717_s1 + $0x60] sm:$0xff]   ;;  %v502_v10 = vld [vmem:[%s717_s1 + $0x68] sm:$0xff]  }
   0x4   :  { %414 = vmatprep.subr.bf16.mxu0 %v494_v2  ;;  %477 = vmatprep.subr.bf16.mxu1 %v494_v2  ;;  %v499_v7 = vld [vmem:[%s717_s1 + $0x18] sm:$0xff]   ;;  %v501_v9 = vld [vmem:[%s717_s1 + $0x20] sm:$0xff]   ;;  %v503_v13 = vld [vmem:[%s717_s1 + $0x28] sm:$0xff]  }
   0x5   :  { %v510_v11 = vld [vmem:[%s718_s0 + $0x4] ss:$8 sps:$4 sm:$0xff]   ;;  %v504_v14 = vld [vmem:[%s717_s1 + $0x70] sm:$0xff]   ;;  %v506_v16 = vld [vmem:[%s717_s1 + $0x78] sm:$0xff]  }
   0x6   :  { %v513_v12 = vld [vmem:[%s718_s0 + $0x44] ss:$8 sps:$4 sm:$0xff]   ;;  %278 = vmatprep.mubr.bf16.mxu0 %v510_v11  ;;  %v505_v15 = vld [vmem:[%s717_s1 + $0x30] sm:$0xff]   ;;  %v507_v17 = vld [vmem:[%s717_s1 + $0x38] sm:$0xff]  }
   0x7   :  { %415 = vmatpush3.bf16.msra.mxu0 %v495_v3  ;;  %485 = vmatpush3.bf16.msra.mxu1 %v495_v3  ;;  %v508_v18 = vld [vmem:[%s718_s0] ss:$8 sps:$4 sm:$0xff]   ;;  %v514_v20 = vld [vmem:[%s718_s0 + $0x14] ss:$8 sps:$4 sm:$0xff]   ;;  %v518_v22 = vld [vmem:[%s718_s0 + $0x10] ss:$8 sps:$4 sm:$0xff]  }
   0x8   :  { %416 = vmatprep.subr.bf16.mxu0 %v496_v4  ;;  %478 = vmatprep.subr.bf16.mxu1 %v496_v4  ;;  %v511_v19 = vld [vmem:[%s718_s0 + $0x40] ss:$8 sps:$4 sm:$0xff]   ;;  %v516_v21 = vld [vmem:[%s718_s0 + $0x54] ss:$8 sps:$4 sm:$0xff]   ;;  %v519_v23 = vld [vmem:[%s718_s0 + $0x50] ss:$8 sps:$4 sm:$0xff]  }
   0x9   :  { %310 = vmatprep.mubr.bf16.mxu1 %v513_v12  ;;  %v520_v24 = vld [vmem:[%s718_s0 + $0x24] ss:$8 sps:$4 sm:$0xff]   ;;  %v524_v26 = vld [vmem:[%s718_s0 + $0x20] ss:$8 sps:$4 sm:$0xff]   ;;  %v526_v28 = vld [vmem:[%s718_s0 + $0x34] ss:$8 sps:$4 sm:$0xff]  }
   0xa   :  { %v522_v25 = vld [vmem:[%s718_s0 + $0x64] ss:$8 sps:$4 sm:$0xff]   ;;  %v525_v27 = vld [vmem:[%s718_s0 + $0x60] ss:$8 sps:$4 sm:$0xff]   ;;  %v528_v29 = vld [vmem:[%s718_s0 + $0x74] ss:$8 sps:$4 sm:$0xff]  }
   0xb   :  { %417 = vmatpush3.bf16.msra.mxu0 %v497_v5  ;;  %486 = vmatpush3.bf16.msra.mxu1 %v497_v5  ;;  %v530_v30 = vld [vmem:[%s718_s0 + $0x30] ss:$8 sps:$4 sm:$0xff]   ;;  %v651_v34 = vld [vmem:[%s719_s2] ss:$0 sm:$0xff] }
   0xc   :  { %418 = vmatprep.subr.bf16.mxu0 %v498_v6  ;;  %479 = vmatprep.subr.bf16.mxu1 %v498_v6  ;;  %v531_v31 = vld [vmem:[%s718_s0 + $0x70] ss:$8 sps:$4 sm:$0xff]  }
   0xf   :  { %419 = vmatpush3.bf16.msra.mxu0 %v499_v7  ;;  %487 = vmatpush3.bf16.msra.mxu1 %v499_v7 }
  0x10   :  { %420 = vmatprep.subr.bf16.mxu0 %v500_v8  ;;  %480 = vmatprep.subr.bf16.mxu1 %v500_v8 }
  0x13   :  { %421 = vmatpush3.bf16.msra.mxu0 %v501_v9  ;;  %488 = vmatpush3.bf16.msra.mxu1 %v501_v9 }
  0x14   :  { %422 = vmatprep.subr.bf16.mxu0 %v502_v10  ;;  %481 = vmatprep.subr.bf16.mxu1 %v502_v10 }
  0x17   :  { %423 = vmatpush3.bf16.msra.mxu0 %v503_v13  ;;  %489 = vmatpush3.bf16.msra.mxu1 %v503_v13 }
  0x18   :  { %424 = vmatprep.subr.bf16.mxu0 %v504_v14  ;;  %482 = vmatprep.subr.bf16.mxu1 %v504_v14 }
  0x1b   :  { %425 = vmatpush3.bf16.msra.mxu0 %v505_v15  ;;  %490 = vmatpush3.bf16.msra.mxu1 %v505_v15 }
  0x1c   :  { %426 = vmatprep.subr.bf16.mxu0 %v506_v16  ;;  %483 = vmatprep.subr.bf16.mxu1 %v506_v16 }
  0x1f   :  { %427 = vmatpush3.bf16.msra.mxu0 %v507_v17  ;;  %491 = vmatpush3.bf16.msra.mxu1 %v507_v17 }
  0x22   :  { %279 = vmatmul.mubr.bf16.vlgmr.msra.gmra.mrb[0].mxu0 %v508_v18  ;;  %311 = vmatmul.mubr.bf16.vlgmr.msra.gmra.mrb[0].mxu1 %v511_v19 }
  0x23   :  { %286 = vmatprep.mubr.bf16.mxu0 %v514_v20  ;;  %318 = vmatprep.mubr.bf16.mxu1 %v516_v21 }
  0x2a   :  { %287 = vmatmul.mubr.bf16.gmra.mrb[4].mxu0 %v518_v22  ;;  %319 = vmatmul.mubr.bf16.gmra.mrb[4].mxu1 %v519_v23 }
  0x2b   :  { %294 = vmatprep.mubr.bf16.mxu0 %v520_v24  ;;  %326 = vmatprep.mubr.bf16.mxu1 %v522_v25 }
  0x32   :  { %295 = vmatmul.mubr.bf16.gmra.mrb[8].mxu0 %v524_v26  ;;  %327 = vmatmul.mubr.bf16.gmra.mrb[8].mxu1 %v525_v27 }
  0x33   :  { %302 = vmatprep.mubr.bf16.mxu0 %v526_v28  ;;  %334 = vmatprep.mubr.bf16.mxu1 %v528_v29 }
  0x3a   :  { %303 = vmatmul.mubr.bf16.gmra.mrb[12].mxu0 %v530_v30  ;;  %335 = vmatmul.mubr.bf16.gmra.mrb[12].mxu1 %v531_v31 }
  0xf5   :  { %v428_v32 = vpop.f32.mrb[0].mxu0  ;;  %v452_v33 = vpop.f32.mrb[0].mxu1 }
  0xf6   :  { %v429_v35 = vpop.f32.mrb[1].mxu0  ;;  %v453_v36 = vpop.f32.mrb[1].mxu1 }
  0xf7   :  { %v430_v37 = vadd.f32 %v429_v35, %v428_v32  ;;  %v454_v38 = vadd.f32 %v453_v36, %v452_v33  ;;  %v431_v39 = vpop.f32.mrb[2].mxu0  ;;  %v455_v40 = vpop.f32.mrb[2].mxu1 }
  0xf8   :  { %v432_v41 = vpop.f32.mrb[3].mxu0  ;;  %v456_v42 = vpop.f32.mrb[3].mxu1 }
  0xf9   :  { %v281_v43 = vadd.f32 %v430_v37, %v651_v34  ;;  %v313_v44 = vadd.f32 %v454_v38, %v651_v34  ;;  %v433_v45 = vadd.f32 %v432_v41, %v431_v39  ;;  %v457_v46 = vadd.f32 %v456_v42, %v455_v40 }
  0xfb   :  { %v343_v47 = vmax.f32 %v281_v43, 0.0  ;;  %v351_v48 = vmax.f32 %v313_v44, 0.0  ;;  %v284_v49 = vadd.f32 %v433_v45, %v651_v34  ;;  %v316_v50 = vadd.f32 %v457_v46, %v651_v34 }
  0xfd   :  { %359 = vst [vmem:[%s720_s3] sm:$0xff] %v343_v47  ;;  %367 = vst [vmem:[%s720_s3 + $0x40] sm:$0xff] %v351_v48  ;;  %v344_v51 = vmax.f32 %v284_v49, 0.0  ;;  %v352_v52 = vmax.f32 %v316_v50, 0.0  ;;  %v434_v53 = vpop.f32.mrb[4].mxu0  ;;  %v458_v54 = vpop.f32.mrb[4].mxu1 }
  0xfe   :  { %v435_v55 = vpop.f32.mrb[5].mxu0  ;;  %v459_v56 = vpop.f32.mrb[5].mxu1 }
  0xff   :  { %360 = vst [vmem:[%s720_s3 + $0x8] sm:$0xff] %v344_v51  ;;  %368 = vst [vmem:[%s720_s3 + $0x48] sm:$0xff] %v352_v52  ;;  %v436_v57 = vadd.f32 %v435_v55, %v434_v53  ;;  %v460_v58 = vadd.f32 %v459_v56, %v458_v54  ;;  %v437_v59 = vpop.f32.mrb[6].mxu0  ;;  %v461_v60 = vpop.f32.mrb[6].mxu1 }
 0x100   :  { %v438_v61 = vpop.f32.mrb[7].mxu0  ;;  %v462_v62 = vpop.f32.mrb[7].mxu1 }
 0x101   :  { %v289_v63 = vadd.f32 %v436_v57, %v651_v34  ;;  %v321_v0 = vadd.f32 %v460_v58, %v651_v34  ;;  %v439_v1 = vadd.f32 %v438_v61, %v437_v59  ;;  %v463_v2 = vadd.f32 %v462_v62, %v461_v60 }
 0x103   :  { %v345_v3 = vmax.f32 %v289_v63, 0.0  ;;  %v353_v4 = vmax.f32 %v321_v0, 0.0  ;;  %v292_v5 = vadd.f32 %v439_v1, %v651_v34  ;;  %v324_v6 = vadd.f32 %v463_v2, %v651_v34 }
 0x105   :  { %361 = vst [vmem:[%s720_s3 + $0x10] sm:$0xff] %v345_v3  ;;  %369 = vst [vmem:[%s720_s3 + $0x50] sm:$0xff] %v353_v4  ;;  %v346_v7 = vmax.f32 %v292_v5, 0.0  ;;  %v354_v8 = vmax.f32 %v324_v6, 0.0  ;;  %v440_v9 = vpop.f32.mrb[8].mxu0  ;;  %v464_v10 = vpop.f32.mrb[8].mxu1 }
 0x106   :  { %v441_v11 = vpop.f32.mrb[9].mxu0  ;;  %v465_v12 = vpop.f32.mrb[9].mxu1 }
 0x107   :  { %362 = vst [vmem:[%s720_s3 + $0x18] sm:$0xff] %v346_v7  ;;  %370 = vst [vmem:[%s720_s3 + $0x58] sm:$0xff] %v354_v8  ;;  %v442_v13 = vadd.f32 %v441_v11, %v440_v9  ;;  %v466_v14 = vadd.f32 %v465_v12, %v464_v10  ;;  %v443_v15 = vpop.f32.mrb[10].mxu0  ;;  %v467_v16 = vpop.f32.mrb[10].mxu1 }
 0x108   :  { %v444_v17 = vpop.f32.mrb[11].mxu0  ;;  %v468_v18 = vpop.f32.mrb[11].mxu1 }
 0x109   :  { %v297_v19 = vadd.f32 %v442_v13, %v651_v34  ;;  %v329_v20 = vadd.f32 %v466_v14, %v651_v34  ;;  %v445_v21 = vadd.f32 %v444_v17, %v443_v15  ;;  %v469_v22 = vadd.f32 %v468_v18, %v467_v16 }
 0x10b   :  { %v347_v23 = vmax.f32 %v297_v19, 0.0  ;;  %v355_v24 = vmax.f32 %v329_v20, 0.0  ;;  %v300_v25 = vadd.f32 %v445_v21, %v651_v34  ;;  %v332_v26 = vadd.f32 %v469_v22, %v651_v34 }
 0x10d   :  { %363 = vst [vmem:[%s720_s3 + $0x20] sm:$0xff] %v347_v23  ;;  %371 = vst [vmem:[%s720_s3 + $0x60] sm:$0xff] %v355_v24  ;;  %v348_v27 = vmax.f32 %v300_v25, 0.0  ;;  %v356_v28 = vmax.f32 %v332_v26, 0.0  ;;  %v446_v29 = vpop.f32.mrb[12].mxu0  ;;  %v470_v30 = vpop.f32.mrb[12].mxu1 }
 0x10e   :  { %v447_v31 = vpop.f32.mrb[13].mxu0  ;;  %v471_v32 = vpop.f32.mrb[13].mxu1 }
 0x10f   :  { %364 = vst [vmem:[%s720_s3 + $0x28] sm:$0xff] %v348_v27  ;;  %372 = vst [vmem:[%s720_s3 + $0x68] sm:$0xff] %v356_v28  ;;  %v448_v33 = vadd.f32 %v447_v31, %v446_v29  ;;  %v472_v35 = vadd.f32 %v471_v32, %v470_v30  ;;  %v449_v36 = vpop.f32.mrb[14].mxu0  ;;  %v473_v37 = vpop.f32.mrb[14].mxu1 }
 0x110   :  { %v450_v38 = vpop.f32.mrb[15].mxu0  ;;  %v474_v39 = vpop.f32.mrb[15].mxu1 }
 0x111   :  { %v305_v40 = vadd.f32 %v448_v33, %v651_v34  ;;  %v337_v41 = vadd.f32 %v472_v35, %v651_v34  ;;  %v451_v42 = vadd.f32 %v450_v38, %v449_v36  ;;  %v475_v43 = vadd.f32 %v474_v39, %v473_v37 }
 0x113   :  { %v349_v44 = vmax.f32 %v305_v40, 0.0  ;;  %v357_v45 = vmax.f32 %v337_v41, 0.0  ;;  %v308_v46 = vadd.f32 %v451_v42, %v651_v34  ;;  %v340_v47 = vadd.f32 %v475_v43, %v651_v34 }
 0x115   :  { %365 = vst [vmem:[%s720_s3 + $0x30] sm:$0xff] %v349_v44  ;;  %373 = vst [vmem:[%s720_s3 + $0x70] sm:$0xff] %v357_v45  ;;  %v350_v48 = vmax.f32 %v308_v46, 0.0  ;;  %v358_v49 = vmax.f32 %v340_v47, 0.0 }
 0x117   :  { %366 = vst [vmem:[%s720_s3 + $0x38] sm:$0xff] %v350_v48  ;;  %374 = vst [vmem:[%s720_s3 + $0x78] sm:$0xff] %v358_v49 }

// kernel: cnn_base_forward.4
= control target key start
LH: loop header
LB: loop body
LE: loop exit
PB: predicated region body
PF: predicated region fallthrough
CT: control target
= control target key end

     0   :  { %s732_s1 = inlined_call_operand.vmem [shape: bf16[512,128], index: 1, kind: input, shape index: {}]   ;;  %s733_s0 = inlined_call_operand.vmem [shape: bf16[32,512], index: 0, kind: input, shape index: {}]   ;;  %s734_s2 = inlined_call_operand.vmem [shape: f32[1,128], index: 2, kind: input, shape index: {}]   ;;  %s735_s3 = inlined_call_operand.vmem [shape: f32[32,128], index: 3, kind: output, shape index: {}]  }
   0x1   :  { %v533_v0 = vld [vmem:[%s732_s1 + $0x40] sm:$0xff]   ;;  %v537_v4 = vld [vmem:[%s732_s1 + $0x48] sm:$0xff]   ;;  %v541_v8 = vld [vmem:[%s732_s1 + $0x50] sm:$0xff]  }
   0x2   :  { %v534_v1 = vld [vmem:[%s732_s1 + $0xc0] sm:$0xff]   ;;  %477 = vmatprep.subr.bf16.mxu0 %v533_v0  ;;  %v538_v5 = vld [vmem:[%s732_s1 + $0xc8] sm:$0xff]   ;;  %v542_v9 = vld [vmem:[%s732_s1 + $0xd0] sm:$0xff]  }
   0x3   :  { %v535_v2 = vld [vmem:[%s732_s1] sm:$0xff]   ;;  %505 = vmatprep.subr.bf16.mxu1 %v534_v1  ;;  %v539_v6 = vld [vmem:[%s732_s1 + $0x8] sm:$0xff]   ;;  %v543_v10 = vld [vmem:[%s732_s1 + $0x10] sm:$0xff]  }
   0x4   :  { %v536_v3 = vld [vmem:[%s732_s1 + $0x80] sm:$0xff]   ;;  %478 = vmatpush3.bf16.msra.mxu0 %v535_v2  ;;  %v540_v7 = vld [vmem:[%s732_s1 + $0x88] sm:$0xff]   ;;  %v544_v11 = vld [vmem:[%s732_s1 + $0x90] sm:$0xff]  }
   0x5   :  { %506 = vmatpush3.bf16.msra.mxu1 %v536_v3  ;;  %479 = vmatprep.subr.bf16.mxu0 %v537_v4  ;;  %v545_v12 = vld [vmem:[%s732_s1 + $0x58] sm:$0xff]   ;;  %v549_v16 = vld [vmem:[%s732_s1 + $0x60] sm:$0xff]   ;;  %v553_v20 = vld [vmem:[%s732_s1 + $0x68] sm:$0xff]  }
   0x6   :  { %507 = vmatprep.subr.bf16.mxu1 %v538_v5  ;;  %v546_v13 = vld [vmem:[%s732_s1 + $0xd8] sm:$0xff]   ;;  %v550_v17 = vld [vmem:[%s732_s1 + $0xe0] sm:$0xff]   ;;  %v554_v21 = vld [vmem:[%s732_s1 + $0xe8] sm:$0xff]  }
   0x7   :  { %v547_v14 = vld [vmem:[%s732_s1 + $0x18] sm:$0xff]   ;;  %v551_v18 = vld [vmem:[%s732_s1 + $0x20] sm:$0xff]   ;;  %v555_v22 = vld [vmem:[%s732_s1 + $0x28] sm:$0xff]  }
   0x8   :  { %480 = vmatpush3.bf16.msra.mxu0 %v539_v6  ;;  %v548_v15 = vld [vmem:[%s732_s1 + $0x98] sm:$0xff]   ;;  %v552_v19 = vld [vmem:[%s732_s1 + $0xa0] sm:$0xff]   ;;  %v556_v23 = vld [vmem:[%s732_s1 + $0xa8] sm:$0xff]  }
   0x9   :  { %508 = vmatpush3.bf16.msra.mxu1 %v540_v7  ;;  %481 = vmatprep.subr.bf16.mxu0 %v541_v8  ;;  %v557_v24 = vld [vmem:[%s732_s1 + $0x70] sm:$0xff]   ;;  %v561_v28 = vld [vmem:[%s732_s1 + $0x78] sm:$0xff]   ;;  %v436_v42 = vld [vmem:[%s734_s2] ss:$0 sm:$0xff] }
   0xa   :  { %509 = vmatprep.subr.bf16.mxu1 %v542_v9  ;;  %v558_v25 = vld [vmem:[%s732_s1 + $0xf0] sm:$0xff]   ;;  %v562_v29 = vld [vmem:[%s732_s1 + $0xf8] sm:$0xff]  }
   0xb   :  { %v559_v26 = vld [vmem:[%s732_s1 + $0x30] sm:$0xff]   ;;  %v563_v30 = vld [vmem:[%s732_s1 + $0x38] sm:$0xff]  }
   0xc   :  { %482 = vmatpush3.bf16.msra.mxu0 %v543_v10  ;;  %v560_v27 = vld [vmem:[%s732_s1 + $0xb0] sm:$0xff]   ;;  %v564_v31 = vld [vmem:[%s732_s1 + $0xb8] sm:$0xff]  }
   0xd   :  { %510 = vmatpush3.bf16.msra.mxu1 %v544_v11  ;;  %483 = vmatprep.subr.bf16.mxu0 %v545_v12  ;;  %v565_v32 = vld [vmem:[%s733_s0] ss:$16 sps:$4 sm:$0xff]   ;;  %v567_v33 = vld [vmem:[%s733_s0 + $0x4] ss:$16 sps:$4 sm:$0xff]   ;;  %v568_v34 = vld [vmem:[%s733_s0 + $0x8] ss:$16 sps:$4 sm:$0xff]  }
   0xe   :  { %511 = vmatprep.subr.bf16.mxu1 %v546_v13  ;;  %v570_v35 = vld [vmem:[%s733_s0 + $0xc] ss:$16 sps:$4 sm:$0xff]   ;;  %358 = vmatprep.mubr.bf16.mxu0 %v567_v33  ;;  %v571_v36 = vld [vmem:[%s733_s0 + $0x24] ss:$16 sps:$4 sm:$0xff]   ;;  %v575_v38 = vld [vmem:[%s733_s0 + $0x20] ss:$16 sps:$4 sm:$0xff]  }
   0xf   :  { %407 = vmatprep.mubr.bf16.mxu1 %v570_v35  ;;  %v573_v37 = vld [vmem:[%s733_s0 + $0x2c] ss:$16 sps:$4 sm:$0xff]   ;;  %v576_v39 = vld [vmem:[%s733_s0 + $0x28] ss:$16 sps:$4 sm:$0xff]  }
  0x10   :  { %484 = vmatpush3.bf16.msra.mxu0 %v547_v14 }
  0x11   :  { %512 = vmatpush3.bf16.msra.mxu1 %v548_v15  ;;  %485 = vmatprep.subr.bf16.mxu0 %v549_v16 }
  0x12   :  { %513 = vmatprep.subr.bf16.mxu1 %v550_v17 }
  0x14   :  { %486 = vmatpush3.bf16.msra.mxu0 %v551_v18 }
  0x15   :  { %514 = vmatpush3.bf16.msra.mxu1 %v552_v19  ;;  %487 = vmatprep.subr.bf16.mxu0 %v553_v20 }
  0x16   :  { %515 = vmatprep.subr.bf16.mxu1 %v554_v21 }
  0x18   :  { %488 = vmatpush3.bf16.msra.mxu0 %v555_v22 }
  0x19   :  { %516 = vmatpush3.bf16.msra.mxu1 %v556_v23  ;;  %489 = vmatprep.subr.bf16.mxu0 %v557_v24 }
  0x1a   :  { %517 = vmatprep.subr.bf16.mxu1 %v558_v25 }
  0x1c   :  { %490 = vmatpush3.bf16.msra.mxu0 %v559_v26 }
  0x1d   :  { %518 = vmatpush3.bf16.msra.mxu1 %v560_v27  ;;  %491 = vmatprep.subr.bf16.mxu0 %v561_v28 }
  0x1e   :  { %519 = vmatprep.subr.bf16.mxu1 %v562_v29 }
  0x20   :  { %492 = vmatpush3.bf16.msra.mxu0 %v563_v30 }
  0x21   :  { %520 = vmatpush3.bf16.msra.mxu1 %v564_v31 }
  0x23   :  { %359 = vmatmul.mubr.bf16.vlgmr.msra.gmra.mrb[0].mxu0 %v565_v32 }
  0x24   :  { %408 = vmatmul.mubr.bf16.vlgmr.msra.gmra.mrb[0].mxu1 %v568_v34  ;;  %366 = vmatprep.mubr.bf16.mxu0 %v571_v36 }
  0x25   :  { %415 = vmatprep.mubr.bf16.mxu1 %v573_v37 }
  0x2b   :  { %367 = vmatmul.mubr.bf16.gmra.mrb[4].mxu0 %v575_v38 }
  0x2c   :  { %416 = vmatmul.mubr.bf16.gmra.mrb[4].mxu1 %v576_v39 }
  0xf6   :  { %v493_v40 = vpop.f32.mrb[0].mxu0 }
  0xf7   :  { %v521_v41 = vpop.f32.mrb[0].mxu1  ;;  %v494_v43 = vpop.f32.mrb[1].mxu0 }
  0xf8   :  { %v495_v44 = vadd.f32 %v494_v43, %v493_v40  ;;  %v522_v45 = vpop.f32.mrb[1].mxu1  ;;  %v496_v46 = vpop.f32.mrb[2].mxu0 }
  0xf9   :  { %v523_v47 = vadd.f32 %v522_v45, %v521_v41  ;;  %v524_v48 = vpop.f32.mrb[2].mxu1  ;;  %v497_v49 = vpop.f32.mrb[3].mxu0 }
  0xfa   :  { %v361_v50 = vadd.f32 %v495_v44, %v436_v42  ;;  %v498_v51 = vadd.f32 %v497_v49, %v496_v46  ;;  %v525_v52 = vpop.f32.mrb[3].mxu1 }
  0xfb   :  { %v526_v53 = vadd.f32 %v525_v52, %v524_v48 }
  0xfc   :  { %v410_v54 = vadd.f32 %v523_v47, %v361_v50  ;;  %v364_v55 = vadd.f32 %v498_v51, %v436_v42 }
  0xfe   :  { %v424_v56 = vmax.f32 %v410_v54, 0.0  ;;  %v413_v57 = vadd.f32 %v526_v53, %v364_v55  ;;  %v499_v58 = vpop.f32.mrb[4].mxu0 }
  0xff   :  { %v527_v59 = vpop.f32.mrb[4].mxu1  ;;  %v500_v60 = vpop.f32.mrb[5].mxu0 }
 0x100   :  { %428 = vst [vmem:[%s735_s3] sm:$0xff] %v424_v56  ;;  %v425_v61 = vmax.f32 %v413_v57, 0.0  ;;  %v501_v62 = vadd.f32 %v500_v60, %v499_v58  ;;  %v528_v63 = vpop.f32.mrb[5].mxu1  ;;  %v502_v0 = vpop.f32.mrb[6].mxu0 }
 0x101   :  { %v529_v1 = vadd.f32 %v528_v63, %v527_v59  ;;  %v530_v2 = vpop.f32.mrb[6].mxu1  ;;  %v503_v3 = vpop.f32.mrb[7].mxu0 }
 0x102   :  { %429 = vst [vmem:[%s735_s3 + $0x8] sm:$0xff] %v425_v61  ;;  %v369_v4 = vadd.f32 %v501_v62, %v436_v42  ;;  %v504_v5 = vadd.f32 %v503_v3, %v502_v0  ;;  %v531_v6 = vpop.f32.mrb[7].mxu1 }
 0x103   :  { %v532_v7 = vadd.f32 %v531_v6, %v530_v2 }
 0x104   :  { %v418_v8 = vadd.f32 %v529_v1, %v369_v4  ;;  %v372_v9 = vadd.f32 %v504_v5, %v436_v42 }
 0x106   :  { %v426_v10 = vmax.f32 %v418_v8, 0.0  ;;  %v421_v11 = vadd.f32 %v532_v7, %v372_v9 }
 0x108   :  { %430 = vst [vmem:[%s735_s3 + $0x10] sm:$0xff] %v426_v10  ;;  %v427_v12 = vmax.f32 %v421_v11, 0.0 }
 0x10a   :  { %431 = vst [vmem:[%s735_s3 + $0x18] sm:$0xff] %v427_v12 }

// kernel: cnn_base_forward.5
= control target key start
LH: loop header
LB: loop body
LE: loop exit
PB: predicated region body
PF: predicated region fallthrough
CT: control target
= control target key end

     0   :  { %v840_v33 = vmov 0.0   ;;  %vm841_vm0 = vmmov 0   ;;  %s1043_s1 = inlined_call_operand.vmem [shape: bf16[640,128], index: 1, kind: input, shape index: {}]   ;;  %s1044_s0 = inlined_call_operand.vmem [shape: bf16[16,640], index: 0, kind: input, shape index: {}]   ;;  %s1045_s3 = inlined_call_operand.vmem [shape: bf16[128,128], index: 3, kind: input, shape index: {}]   ;;  %s1046_s2 = inlined_call_operand.vmem [shape: f32[1,128], index: 2, kind: input, shape index: {}]   ;;  %s1047_s4 = inlined_call_operand.vmem [shape: f32[1,128], index: 4, kind: input, shape index: {}]   ;;  %s1048_s5 = inlined_call_operand.vmem [shape: f32[16,128], index: 5, kind: output, shape index: {}]  }
   0x1   :  { %v785_v0 = vld [vmem:[%s1043_s1 + $0x40] sm:$0xff]   ;;  %v789_v4 = vld [vmem:[%s1043_s1 + $0x48] sm:$0xff]   ;;  %v793_v8 = vld [vmem:[%s1043_s1 + $0x50] sm:$0xff]  }
   0x2   :  { %v786_v1 = vld [vmem:[%s1043_s1] sm:$0xff]   ;;  %681 = vmatprep.subr.bf16.mxu0 %v785_v0  ;;  %v790_v5 = vld [vmem:[%s1043_s1 + $0x8] sm:$0xff]   ;;  %v794_v9 = vld [vmem:[%s1043_s1 + $0x10] sm:$0xff]  }
   0x3   :  { %v787_v2 = vld [vmem:[%s1043_s1 + $0xc0] sm:$0xff]   ;;  %682 = vmatpush3.bf16.msra.mxu0 %v786_v1  ;;  %v791_v6 = vld [vmem:[%s1043_s1 + $0xc8] sm:$0xff]   ;;  %v795_v10 = vld [vmem:[%s1043_s1 + $0xd0] sm:$0xff]  }
   0x4   :  { %v788_v3 = vld [vmem:[%s1043_s1 + $0x80] sm:$0xff]   ;;  %703 = vmatprep.subr.bf16.mxu1 %v787_v2  ;;  %683 = vmatprep.subr.bf16.mxu0 %v789_v4  ;;  %v792_v7 = vld [vmem:[%s1043_s1 + $0x88] sm:$0xff]   ;;  %v796_v11 = vld [vmem:[%s1043_s1 + $0x90] sm:$0xff]  }
   0x5   :  { %704 = vmatpush3.bf16.msra.mxu1 %v788_v3  ;;  %v797_v12 = vld [vmem:[%s1043_s1 + $0x58] sm:$0xff]   ;;  %v801_v16 = vld [vmem:[%s1043_s1 + $0x60] sm:$0xff]   ;;  %v805_v20 = vld [vmem:[%s1043_s1 + $0x68] sm:$0xff]  }
   0x6   :  { %705 = vmatprep.subr.bf16.mxu1 %v791_v6  ;;  %v798_v13 = vld [vmem:[%s1043_s1 + $0x18] sm:$0xff]   ;;  %v802_v17 = vld [vmem:[%s1043_s1 + $0x20] sm:$0xff]   ;;  %v806_v21 = vld [vmem:[%s1043_s1 + $0x28] sm:$0xff]  }
   0x7   :  { %684 = vmatpush3.bf16.msra.mxu0 %v790_v5  ;;  %v799_v14 = vld [vmem:[%s1043_s1 + $0xd8] sm:$0xff]   ;;  %v803_v18 = vld [vmem:[%s1043_s1 + $0xe0] sm:$0xff]   ;;  %v807_v22 = vld [vmem:[%s1043_s1 + $0xe8] sm:$0xff]  }
   0x8   :  { %685 = vmatprep.subr.bf16.mxu0 %v793_v8  ;;  %v800_v15 = vld [vmem:[%s1043_s1 + $0x98] sm:$0xff]   ;;  %v804_v19 = vld [vmem:[%s1043_s1 + $0xa0] sm:$0xff]   ;;  %v808_v23 = vld [vmem:[%s1043_s1 + $0xa8] sm:$0xff]  }
   0x9   :  { %706 = vmatpush3.bf16.msra.mxu1 %v792_v7  ;;  %v809_v24 = vld [vmem:[%s1043_s1 + $0x70] sm:$0xff]   ;;  %v813_v28 = vld [vmem:[%s1043_s1 + $0x78] sm:$0xff]   ;;  %v822_v36 = vld [vmem:[%s1044_s0 + $0xc] ss:$20 sps:$4 sm:$0xff]  }
   0xa   :  { %707 = vmatprep.subr.bf16.mxu1 %v795_v10  ;;  %v810_v25 = vld [vmem:[%s1043_s1 + $0x30] sm:$0xff]   ;;  %v814_v29 = vld [vmem:[%s1043_s1 + $0x38] sm:$0xff]   ;;  %v823_v37 = vld [vmem:[%s1043_s1 + $0x100] sm:$0xff]   ;;  %453 = vmatprep.mubr.bf16.mxu1 %v822_v36 }
   0xb   :  { %686 = vmatpush3.bf16.msra.mxu0 %v794_v9  ;;  %v811_v26 = vld [vmem:[%s1043_s1 + $0xf0] sm:$0xff]   ;;  %v815_v30 = vld [vmem:[%s1043_s1 + $0xf8] sm:$0xff]   ;;  %v824_v38 = vld [vmem:[%s1043_s1 + $0x108] sm:$0xff]  }
   0xc   :  { %687 = vmatprep.subr.bf16.mxu0 %v797_v12  ;;  %v812_v27 = vld [vmem:[%s1043_s1 + $0xb0] sm:$0xff]   ;;  %v818_v32 = vld [vmem:[%s1044_s0 + $0x4] ss:$20 sps:$4 sm:$0xff]   ;;  %v820_v35 = vld [vmem:[%s1044_s0 + $0x8] ss:$20 sps:$4 sm:$0xff]  }
   0xd   :  { %708 = vmatpush3.bf16.msra.mxu1 %v796_v11  ;;  %v816_v31 = vld [vmem:[%s1044_s0] ss:$20 sps:$4 sm:$0xff]   ;;  %v819_v34 = vld [vmem:[%s1043_s1 + $0xb8] sm:$0xff]   ;;  %412 = vmatprep.mubr.bf16.mxu0 %v818_v32  ;;  %v828_v42 = vld [vmem:[%s1043_s1 + $0x128] sm:$0xff]  }
   0xe   :  { %709 = vmatprep.subr.bf16.mxu1 %v799_v14  ;;  %v825_v39 = vld [vmem:[%s1043_s1 + $0x110] sm:$0xff]   ;;  %v826_v40 = vld [vmem:[%s1043_s1 + $0x118] sm:$0xff]   ;;  %v827_v41 = vld [vmem:[%s1043_s1 + $0x120] sm:$0xff]  }
   0xf   :  { %688 = vmatpush3.bf16.msra.mxu0 %v798_v13  ;;  %v829_v43 = vld [vmem:[%s1043_s1 + $0x130] sm:$0xff]   ;;  %v830_v44 = vld [vmem:[%s1043_s1 + $0x138] sm:$0xff]   ;;  %v832_v46 = vld [vmem:[%s1045_s3] sm:$0xff]  }
  0x10   :  { %689 = vmatprep.subr.bf16.mxu0 %v801_v16  ;;  %v831_v45 = vld [vmem:[%s1044_s0 + $0x10] ss:$20 sps:$4 sm:$0xff]   ;;  %v833_v47 = vld [vmem:[%s1045_s3 + $0x8] sm:$0xff]   ;;  %v835_v49 = vld [vmem:[%s1045_s3 + $0x18] sm:$0xff]  }
  0x11   :  { %710 = vmatpush3.bf16.msra.mxu1 %v800_v15  ;;  %v834_v48 = vld [vmem:[%s1045_s3 + $0x10] sm:$0xff]   ;;  %v836_v50 = vld [vmem:[%s1045_s3 + $0x20] sm:$0xff]   ;;  %v837_v51 = vld [vmem:[%s1045_s3 + $0x28] sm:$0xff]  }
  0x12   :  { %711 = vmatprep.subr.bf16.mxu1 %v803_v18  ;;  %v838_v52 = vld [vmem:[%s1045_s3 + $0x30] sm:$0xff]   ;;  %v839_v53 = vld [vmem:[%s1045_s3 + $0x38] sm:$0xff]   ;;  %v626_v55 = vld [vmem:[%s1046_s2] ss:$0 sm:$0xff] }
  0x13   :  { %690 = vmatpush3.bf16.msra.mxu0 %v802_v17  ;;  %v672_v16 = vld [vmem:[%s1047_s4] ss:$0 sm:$0xff] }
  0x14   :  { %691 = vmatprep.subr.bf16.mxu0 %v805_v20 }
  0x15   :  { %712 = vmatpush3.bf16.msra.mxu1 %v804_v19 }
  0x16   :  { %713 = vmatprep.subr.bf16.mxu1 %v807_v22 }
  0x17   :  { %692 = vmatpush3.bf16.msra.mxu0 %v806_v21 }
  0x18   :  { %693 = vmatprep.subr.bf16.mxu0 %v809_v24 }
  0x19   :  { %714 = vmatpush3.bf16.msra.mxu1 %v808_v23 }
  0x1a   :  { %715 = vmatprep.subr.bf16.mxu1 %v811_v26 }
  0x1b   :  { %694 = vmatpush3.bf16.msra.mxu0 %v810_v25 }
  0x1c   :  { %695 = vmatprep.subr.bf16.mxu0 %v813_v28 }
  0x1d   :  { %716 = vmatpush3.bf16.msra.mxu1 %v812_v27 }
  0x1e   :  { %717 = vmatprep.subr.bf16.mxu1 %v815_v30 }
  0x1f   :  { %696 = vmatpush3.bf16.msra.mxu0 %v814_v29 }
  0x20   :  { %743 = vmatprep.subr.bf16.mxu0 %v840_v33 }
  0x21   :  { %718 = vmatpush3.bf16.msra.mxu1 %v819_v34 }
  0x22   :  { %413 = vmatmul.mubr.bf16.vlgmr.msra.gmra.mrb[0].mxu0 %v816_v31  ;;  %763 = vmatprep.subr.bf16.mxu1 %v840_v33 }
  0x23   :  { %759 = vmatprep.mubr.msk.bf16.mxu0 %vm841_vm0, %v840_v33  ;;  %744 = vmatpush3.bf16.msra.mxu0 %v823_v37 }
  0x24   :  { %454 = vmatmul.mubr.bf16.vlgmr.msra.gmra.mrb[0].mxu1 %v820_v35  ;;  %745 = vmatprep.subr.bf16.mxu0 %v840_v33 }
  0x25   :  { %779 = vmatprep.mubr.msk.bf16.mxu1 %vm841_vm0, %v840_v33  ;;  %764 = vmatpush3.bf16.msra.mxu1 %v832_v46 }
  0x26   :  { %765 = vmatprep.subr.bf16.mxu1 %v840_v33 }
  0x27   :  { %746 = vmatpush3.bf16.msra.mxu0 %v824_v38 }
  0x28   :  { %747 = vmatprep.subr.bf16.mxu0 %v840_v33 }
  0x29   :  { %766 = vmatpush3.bf16.msra.mxu1 %v833_v47 }
  0x2a   :  { %767 = vmatprep.subr.bf16.mxu1 %v840_v33 }
  0x2b   :  { %748 = vmatpush3.bf16.msra.mxu0 %v825_v39 }
  0x2c   :  { %749 = vmatprep.subr.bf16.mxu0 %v840_v33 }
  0x2d   :  { %768 = vmatpush3.bf16.msra.mxu1 %v834_v48 }
  0x2e   :  { %769 = vmatprep.subr.bf16.mxu1 %v840_v33 }
  0x2f   :  { %750 = vmatpush3.bf16.msra.mxu0 %v826_v40 }
  0x30   :  { %751 = vmatprep.subr.bf16.mxu0 %v840_v33 }
  0x31   :  { %770 = vmatpush3.bf16.msra.mxu1 %v835_v49 }
  0x32   :  { %771 = vmatprep.subr.bf16.mxu1 %v840_v33 }
  0x33   :  { %752 = vmatpush3.bf16.msra.mxu0 %v827_v41 }
  0x34   :  { %753 = vmatprep.subr.bf16.mxu0 %v840_v33 }
  0x35   :  { %772 = vmatpush3.bf16.msra.mxu1 %v836_v50 }
  0x36   :  { %773 = vmatprep.subr.bf16.mxu1 %v840_v33 }
  0x37   :  { %754 = vmatpush3.bf16.msra.mxu0 %v828_v42 }
  0x38   :  { %755 = vmatprep.subr.bf16.mxu0 %v840_v33 }
  0x39   :  { %774 = vmatpush3.bf16.msra.mxu1 %v837_v51 }
  0x3a   :  { %775 = vmatprep.subr.bf16.mxu1 %v840_v33 }
  0x3b   :  { %756 = vmatpush3.bf16.msra.mxu0 %v829_v43 }
  0x3c   :  { %757 = vmatprep.subr.bf16.mxu0 %v840_v33 }
  0x3d   :  { %776 = vmatpush3.bf16.msra.mxu1 %v838_v52 }
  0x3e   :  { %777 = vmatprep.subr.bf16.mxu1 %v840_v33 }
  0x3f   :  { %758 = vmatpush3.bf16.msra.mxu0 %v830_v44 }
  0x41   :  { %778 = vmatpush3.bf16.msra.mxu1 %v839_v53 }
  0x42   :  { %760 = vmatmul.mubr.bf16.vlgmr.msra.gmra.mrb[4].mxu0 %v831_v45 }
  0xf5   :  { %v697_v54 = vpop.f32.mrb[0].mxu0 }
  0xf6   :  { %v698_v56 = vpop.f32.mrb[1].mxu0 }
  0xf7   :  { %v699_v57 = vadd.f32 %v698_v56, %v697_v54  ;;  %v700_v58 = vpop.f32.mrb[2].mxu0  ;;  %v719_v59 = vpop.f32.mrb[0].mxu1 }
  0xf8   :  { %v701_v60 = vpop.f32.mrb[3].mxu0  ;;  %v720_v63 = vpop.f32.mrb[1].mxu1 }
  0xf9   :  { %v415_v61 = vadd.f32 %v699_v57, %v626_v55  ;;  %v702_v62 = vadd.f32 %v701_v60, %v700_v58  ;;  %v721_v0 = vadd.f32 %v720_v63, %v719_v59  ;;  %v722_v1 = vpop.f32.mrb[2].mxu1 }
  0xfa   :  { %v723_v3 = vpop.f32.mrb[3].mxu1 }
  0xfb   :  { %v418_v2 = vadd.f32 %v702_v62, %v626_v55  ;;  %v724_v4 = vadd.f32 %v723_v3, %v722_v1  ;;  %v456_v5 = vadd.f32 %v721_v0, %v415_v61 }
  0xfd   :  { %v459_v6 = vadd.f32 %v724_v4, %v418_v2 }
 0x115   :  { %v496_v7 = vpop.f32.mrb[4].mxu0 }
 0x116   :  { %v497_v8 = vadd.f32 %v496_v7, %v456_v5  ;;  %v761_v9 = vpop.f32.mrb[5].mxu0 }
 0x117   :  { %v499_v10 = vpop.f32.mrb[6].mxu0 }
 0x118   :  { %v500_v11 = vadd.f32 %v499_v10, %v459_v6  ;;  %v762_v12 = vpop.f32.mrb[7].mxu0  ;;  %v503_v13 = vmax.f32 %v497_v8, 0.0 }
 0x11a   :  { %v504_v14 = vmax.f32 %v500_v11, 0.0 }
 0x11c   :  { %v505_v15 = vpack.c.bf16 %v504_v14, %v503_v13 }
 0x11e   :  { %780 = vmatmul.mubr.bf16.vlgmr.msra.gmra.mrb[4].mxu1 %v505_v15 }
 0x1f1   :  { %v611_v17 = vpop.f32.mrb[4].mxu1 }
 0x1f2   :  { %v612_v18 = vadd.f32 %v672_v16, %v611_v17  ;;  %v781_v19 = vpop.f32.mrb[5].mxu1 }
 0x1f3   :  { %v614_v20 = vpop.f32.mrb[6].mxu1 }
 0x1f4   :  { %v618_v21 = vmax.f32 %v612_v18, 0.0  ;;  %v615_v22 = vadd.f32 %v672_v16, %v614_v20  ;;  %v782_v23 = vpop.f32.mrb[7].mxu1 }
 0x1f6   :  { %620 = vst [vmem:[%s1048_s5] sm:$0xff] %v618_v21  ;;  %v619_v24 = vmax.f32 %v615_v22, 0.0 }
 0x1f8   :  { %621 = vst [vmem:[%s1048_s5 + $0x8] sm:$0xff] %v619_v24 }

</bundles_post_ra>
